<compile_context>
chip_gen: v7x
topology: tpu7x:2x2x1
jax: 0.10.0
libtpu: 0.0.40
codegen_flags: <defaults>
</compile_context>

<pallas_src>
import functools

import jax
import jax.numpy as jnp
from jax.experimental import pallas as pl
from jax.experimental.pallas import tpu as pltpu


def _round_up(x, m):
    return ((x + m - 1) // m) * m


def _scatter_kernel(kstart_ref, kcount_ref, flat_ref, vf_ref, out_ref, *scratch,
                    acc_into_out, precision):
    # kstart_ref/kcount_ref: (T,) int32 in SMEM (scalar prefetch) - per-row-tile
    #                        first voxel chunk and number of chunks to visit.
    # flat_ref: (1, TK)  int32 packed target row per voxel (-1 / sentinel => no match)
    # vf_ref:   (TK, PC) packed voxel-feature chunk (compute dtype)
    # out_ref:  (TM, PC) dense packed row tile
    # scratch:  optional (TM, PC) f32 accumulator (only when out dtype != f32)
    acc_ref = out_ref if acc_into_out else scratch[0]
    t = pl.program_id(0)
    k = pl.program_id(1)
    tm = out_ref.shape[0]
    tk = vf_ref.shape[0]

    @pl.when(k == 0)
    def _():
        acc_ref[...] = jnp.zeros_like(acc_ref)

    @pl.when(k < kcount_ref[t])
    def _():
        # Shift flat by the tile origin (cheap (1,TK) op) and compare against a
        # grid-invariant iota -> 2 full-tile VPU ops (cmp + cast) per step.
        local = flat_ref[...] - t * tm                                   # (1, TK)
        row_ids = jax.lax.broadcasted_iota(jnp.int32, (tm, tk), 0)       # invariant
        onehot = (row_ids == local).astype(vf_ref.dtype)                 # (TM, TK)
        acc_ref[...] += jnp.dot(onehot, vf_ref[...],
                                preferred_element_type=jnp.float32,
                                precision=precision)

    if not acc_into_out:
        @pl.when(k == pl.num_programs(1) - 1)
        def _():
            out_ref[...] = acc_ref[...].astype(out_ref.dtype)


def _scatter_nd_pallas(kstart, kcount, flat_packed, vf_packed, rows_padded,
                       packed_c, tile_rows, tile_k, out_dtype, precision):
    n_padded = vf_packed.shape[0]
    num_row_tiles = rows_padded // tile_rows
    num_k_chunks = n_padded // tile_k
    acc_into_out = jnp.dtype(out_dtype) == jnp.dtype(jnp.float32)

    def chunk_idx(t, k, ks_ref, kc_ref):
        # Visit chunks [ks, ks+kc); once past the range, clamp to the last valid
        # chunk so the block index does not change and no DMA is issued.
        step = jnp.minimum(k, jnp.maximum(kc_ref[t] - 1, 0))
        return jnp.minimum(ks_ref[t] + step, num_k_chunks - 1)

    kernel = functools.partial(_scatter_kernel,
                               acc_into_out=acc_into_out,
                               precision=precision)
    scratch = [] if acc_into_out else [pltpu.VMEM((tile_rows, packed_c),
                                                  jnp.float32)]
    cost = pl.CostEstimate(
        flops=2 * n_padded * packed_c * tile_rows,
        transcendentals=0,
        bytes_accessed=int(rows_padded * packed_c * jnp.dtype(out_dtype).itemsize
                           + n_padded * packed_c * vf_packed.dtype.itemsize
                           + n_padded * 4),
    )
    return pl.pallas_call(
        kernel,
        out_shape=jax.ShapeDtypeStruct((rows_padded, packed_c), out_dtype),
        grid_spec=pltpu.PrefetchScalarGridSpec(
            num_scalar_prefetch=2,
            grid=(num_row_tiles, num_k_chunks),
            in_specs=[
                pl.BlockSpec((1, tile_k),
                             lambda t, k, ks, kc: (0, chunk_idx(t, k, ks, kc))),
                pl.BlockSpec((tile_k, packed_c),
                             lambda t, k, ks, kc: (chunk_idx(t, k, ks, kc), 0)),
            ],
            out_specs=pl.BlockSpec((tile_rows, packed_c),
                                   lambda t, k, ks, kc: (t, 0)),
            scratch_shapes=scratch,
        ),
        compiler_params=pltpu.CompilerParams(
            dimension_semantics=("parallel", "arbitrary"),
        ),
        cost_estimate=cost,
    )(kstart, kcount, flat_packed, vf_packed)


class VoxelnetScatter:
    """JAX/Pallas port of VoxelnetScatter (no learned parameters)."""

    def __init__(self, output_shape, num_input_features):
        self.name = "VoxelnetScatter"
        self.voxel_output_shape = list(output_shape)   # [_, D, H, W, C]
        self.n_channels_out = num_input_features

    def forward(self, voxel_features, coors, batch_size, map_fm=None,
                valid_mask=None, tile_rows=2048, tile_k=1024,
                compute_dtype=None, channels_last=False):
        d, h, w, c = self.voxel_output_shape[1:]
        n = voxel_features.shape[0]
        out_dtype = voxel_features.dtype
        if compute_dtype is None:
            compute_dtype = out_dtype     # no silent precision loss for f32 inputs
        precision = (jax.lax.Precision.HIGHEST
                     if jnp.dtype(compute_dtype) == jnp.dtype(jnp.float32)
                     else None)
        coors = coors.astype(jnp.int32)
        total_rows = batch_size * d * h * w

        # Flatten (b, z, y, x) -> row index of the [B*D*H*W, C] slab.
        flat = ((coors[:, 0] * d + coors[:, 1]) * h + coors[:, 2]) * w + coors[:, 3]
        invalid = jnp.any(coors < 0, axis=1)
        if valid_mask is not None:
            invalid = invalid | jnp.logical_not(valid_mask)
        flat = jnp.where(invalid, -1, flat)

        # Lane packing to 256 output lanes (full 256-wide MXU on v6e/v7x,
        # unmasked lane-dense stores).  C is padded up to a power of two <= 256,
        # or to a multiple of 128 when C > 256.
        if c <= 256:
            cp = 1 << max(c - 1, 0).bit_length()
            cp = max(cp, 1)
            kpack = 256 // cp
        else:
            cp = _round_up(c, 128)
            kpack = 1
        packed_c = kpack * cp
        rows_packed = pl.cdiv(total_rows, kpack)

        vf = voxel_features.astype(compute_dtype)
        if cp != c:
            vf = jnp.pad(vf, ((0, 0), (0, cp - c)))

        if kpack > 1:
            slot = jnp.where(invalid, 0, flat % kpack)
            packed_row = jnp.where(invalid, -1, flat // kpack)
            slot_onehot = (jax.lax.broadcasted_iota(jnp.int32, (n, kpack), 1)
                           == slot[:, None]).astype(compute_dtype)
            vf_packed = (slot_onehot[:, :, None] * vf[:, None, :]
                         ).reshape(n, packed_c)
        else:
            packed_row = flat
            vf_packed = vf

        # Tile sizes (multiples of 16 / 128; keep >= 2 row tiles when possible
        # so the "parallel" row axis shards across v7x's two TensorCores).
        tile_k = _round_up(min(tile_k, _round_up(n, 128)), 128)
        n_padded = _round_up(n, tile_k)
        tile_rows = min(tile_rows, _round_up(rows_packed, 16))
        if rows_packed <= tile_rows and rows_packed >= 32:
            tile_rows = pl.cdiv(rows_packed, 2)
        tile_rows = _round_up(max(tile_rows, 16), 16)
        rows_padded = _round_up(rows_packed, tile_rows)
        num_row_tiles = rows_padded // tile_rows
        num_k_chunks = n_padded // tile_k

        # Sort voxels by target packed row so each row tile only touches the
        # voxel chunks whose rows overlap its range; invalid voxels (-1) sort to
        # the front and are excluded, padding uses a sentinel that never matches.
        order = jnp.argsort(packed_row)
        packed_row_s = jnp.pad(packed_row[order], (0, n_padded - n),
                               constant_values=rows_padded)
        vf_packed_s = jnp.pad(vf_packed[order], ((0, n_padded - n), (0, 0)))

        bounds = jnp.arange(num_row_tiles + 1, dtype=jnp.int32) * tile_rows
        edges = jnp.searchsorted(packed_row_s, bounds, side="left").astype(jnp.int32)
        start, end = edges[:-1], edges[1:]
        kstart = jnp.minimum(start // tile_k, num_k_chunks - 1).astype(jnp.int32)
        kcount = jnp.where(end > start,
                           (end - 1) // tile_k + 1 - start // tile_k,
                           0).astype(jnp.int32)

        flat_in = packed_row_s.reshape(1, n_padded)

        dense_packed = _scatter_nd_pallas(
            kstart, kcount, flat_in, vf_packed_s, rows_padded, packed_c,
            tile_rows, tile_k, out_dtype, precision)

        # Unpack lanes back to (total_rows, C) and reshape to NDHWC.
        dense = dense_packed[:rows_packed].reshape(rows_packed * kpack, cp)
        dense = dense[:total_rows, :c]
        ret = dense.reshape(batch_size, d, h, w, c)          # [B, D, H, W, C]

        if map_fm is not None:
            # map_fm: [B, W, H, D, Cm] -> [B, D, H, W, Cm]; concat channels-last
            # so only ONE full-slab transpose happens below.
            map_ndhwc = jnp.transpose(map_fm, (0, 3, 2, 1, 4)).astype(ret.dtype)
            ret = jnp.concatenate((ret, map_ndhwc), axis=-1)

        if channels_last:
            return ret                                        # [B, D, H, W, C(+Cm)]
        # TODO(synk): for kpack == 1 (C >= 256) this transpose could be folded
        #             into the kernel by emitting (packed_c, tile_rows) tiles.
        return jnp.transpose(ret, (0, 4, 1, 2, 3))            # [B, C(+Cm), D, H, W]

    __call__ = forward


def _reference(voxel_features, coors, batch_size, output_shape, map_fm=None):
    """Pure-JAX reference mirroring the PyTorch scatter_nd + permute + cat."""
    d, h, w, c = output_shape[1:]
    ret = jnp.zeros((batch_size, d, h, w, c), voxel_features.dtype)
    ret = ret.at[coors[:, 0], coors[:, 1], coors[:, 2], coors[:, 3]].set(voxel_features)
    ret = ret.transpose(0, 4, 1, 2, 3)
    if map_fm is not None:
        ret = jnp.concatenate(
            (ret, jnp.transpose(map_fm, (0, 4, 3, 2, 1)).astype(ret.dtype)), axis=1)
    return ret


if __name__ == "__main__":
    key = jax.random.PRNGKey(0)
    k_feat, k_idx, k_map = jax.random.split(key, 3)

    # Small shapes: batch=2, grid D=4, H=8, W=8, C=32 features, N=200 voxels.
    batch_size, D, H, W, C = 2, 4, 8, 8, 32
    N = 200
    Cm = 2
    output_shape = [batch_size, D, H, W, C]   # element 0 is ignored in forward()

    # Unique voxel coordinates (b, z, y, x) — uniqueness matters: duplicates are
    # summed by the kernel vs. last-write-wins in the reference.
    total_rows = batch_size * D * H * W
    flat_unique = jax.random.choice(k_idx, total_rows, shape=(N,), replace=False)
    bz = flat_unique // (D * H * W)
    rem = flat_unique % (D * H * W)
    zz = rem // (H * W)
    rem = rem % (H * W)
    yy = rem // W
    xx = rem % W
    coors = jnp.stack([bz, zz, yy, xx], axis=1).astype(jnp.int32)

    scatter = VoxelnetScatter(output_shape, num_input_features=C)

    # ---- bf16 path (full-rate MXU), small tile_k to exercise the multi-chunk
    #      range-limited K loop.  One-hot select of bf16 values is exact.
    vf_bf16 = jax.random.normal(k_feat, (N, C), dtype=jnp.float32).astype(jnp.bfloat16)
    map_bf16 = jax.random.normal(
        k_map, (batch_size, W, H, D, Cm), dtype=jnp.float32).astype(jnp.bfloat16)

    out = scatter(vf_bf16, coors, batch_size, map_bf16, tile_k=128)
    out = jax.block_until_ready(out)
    ref = _reference(vf_bf16, coors, batch_size, output_shape, map_bf16)
    assert out.shape == (batch_size, C + Cm, D, H, W), out.shape
    assert jnp.allclose(out.astype(jnp.float32), ref.astype(jnp.float32),
                        atol=1e-3, rtol=1e-3), "bf16 path mismatch vs reference"

    # ---- f32 path (default compute dtype = f32, HIGHEST precision one-hot,
    #      direct accumulation into the f32 output block), no map_fm.
    vf_f32 = jax.random.normal(k_feat, (N, C), dtype=jnp.float32)
    out32 = scatter(vf_f32, coors, batch_size, None)
    out32 = jax.block_until_ready(out32)
    ref32 = _reference(vf_f32, coors, batch_size, output_shape, None)
    assert out32.shape == (batch_size, C, D, H, W), out32.shape
    assert jnp.allclose(out32, ref32, atol=1e-5, rtol=1e-5), "f32 path mismatch"

    print("KERNEL_OK")
</pallas_src>

<mosaic_0001>
module attributes {stable_mosaic.version = 11 : i64} {
  func.func @_scatter_kernel(%arg0: i32, %arg1: i32, %arg2: memref<2xi32, #tpu.memory_space<smem>>, %arg3: memref<2xi32, #tpu.memory_space<smem>>, %arg4: memref<1x128xi32, #tpu.memory_space<vmem>>, %arg5: memref<128x256xbf16, #tpu.memory_space<vmem>>, %arg6: memref<32x256xbf16, #tpu.memory_space<vmem>>, %arg7: memref<32x256xf32, #tpu.memory_space<vmem>>) attributes {dimension_semantics = [#tpu.dimension_semantics<parallel>, #tpu.dimension_semantics<arbitrary>], iteration_bounds = array<i64: 2, 2>, scalar_prefetch = 2 : i64, scratch_operands = 1 : i64, tpu.core_type = #tpu.core_type<tc>, window_params = [{transform_indices = @transform_0, window_bounds = array<i64: 1, 128>}, {transform_indices = @transform_1, window_bounds = array<i64: 128, 256>}, {transform_indices = @transform_2, window_bounds = array<i64: 32, 256>}]} {
    %c0_i32 = arith.constant 0 : i32
    %0 = arith.cmpi eq, %arg1, %c0_i32 : i32
    %1 = arith.extui %0 : i1 to i32
    %c0_i32_0 = arith.constant 0 : i32
    %2 = arith.cmpi ne, %1, %c0_i32_0 : i32
    scf.if %2 {
      %cst = arith.constant 0.000000e+00 : f32
      %11 = vector.broadcast %cst : f32 to vector<32x256xf32>
      %c0 = arith.constant 0 : index
      %c0_3 = arith.constant 0 : index
      %12 = vector.load %arg7[%c0, %c0_3] : memref<32x256xf32, #tpu.memory_space<vmem>>, vector<32x256xf32>
      tpu.vector_store %arg7[%c0, %c0_3], %11 {strides = array<i32>} : memref<32x256xf32, #tpu.memory_space<vmem>>, vector<32x256xf32>,
    } else {
    }
    %3 = arith.index_cast %arg0 : i32 to index
    %4 = memref.load %arg3[%3] : memref<2xi32, #tpu.memory_space<smem>>
    %5 = arith.cmpi slt, %arg1, %4 : i32
    %6 = arith.extui %5 : i1 to i32
    %c0_i32_1 = arith.constant 0 : i32
    %7 = arith.cmpi ne, %6, %c0_i32_1 : i32
    scf.if %7 {
      %c0 = arith.constant 0 : index
      %c0_3 = arith.constant 0 : index
      %11 = vector.load %arg4[%c0, %c0_3] : memref<1x128xi32, #tpu.memory_space<vmem>>, vector<1x128xi32>
      %c32_i32 = arith.constant 32 : i32
      %12 = arith.muli %arg0, %c32_i32 : i32
      %13 = vector.broadcast %12 : i32 to vector<1x128xi32>
      %14 = arith.subi %11, %13 : vector<1x128xi32>
      %15 = tpu.iota {dimensions = array<i32: 0>} : vector<32x128xi32>
      %16 = vector.broadcast %14 : vector<1x128xi32> to vector<32x128xi32>
      %17 = arith.cmpi eq, %15, %16 : vector<32x128xi32>
      %18 = arith.extui %17 : vector<32x128xi1> to vector<32x128xi32>
      %19 = arith.sitofp %18 : vector<32x128xi32> to vector<32x128xf32>
      %20 = arith.truncf %19 : vector<32x128xf32> to vector<32x128xbf16>
      %c0_4 = arith.constant 0 : index
      %c0_5 = arith.constant 0 : index
      %21 = vector.load %arg7[%c0_4, %c0_5] : memref<32x256xf32, #tpu.memory_space<vmem>>, vector<32x256xf32>
      %c0_6 = arith.constant 0 : index
      %c0_7 = arith.constant 0 : index
      %22 = vector.load %arg5[%c0_6, %c0_7] : memref<128x256xbf16, #tpu.memory_space<vmem>>, vector<128x256xbf16>
      %cst = arith.constant dense<0.000000e+00> : vector<32x256xf32>
      %23 = tpu.matmul %20, %22, %cst {dimension_numbers = #tpu.dot_dimension_numbers<[1], [0], [0], [1], [0, 0, 1, 1], [], []>} : vector<32x128xbf16>, vector<128x256xbf16>, vector<32x256xf32> -> vector<32x256xf32>
      %24 = arith.addf %21, %23 : vector<32x256xf32>
      %c0_8 = arith.constant 0 : index
      %c0_9 = arith.constant 0 : index
      %25 = vector.load %arg7[%c0_8, %c0_9] : memref<32x256xf32, #tpu.memory_space<vmem>>, vector<32x256xf32>
      tpu.vector_store %arg7[%c0_8, %c0_9], %24 {strides = array<i32>} : memref<32x256xf32, #tpu.memory_space<vmem>>, vector<32x256xf32>,
    } else {
    }
    %c1_i32 = arith.constant 1 : i32
    %8 = arith.cmpi eq, %arg1, %c1_i32 : i32
    %9 = arith.extui %8 : i1 to i32
    %c0_i32_2 = arith.constant 0 : i32
    %10 = arith.cmpi ne, %9, %c0_i32_2 : i32
    scf.if %10 {
      %c0 = arith.constant 0 : index
      %c0_3 = arith.constant 0 : index
      %11 = vector.load %arg7[%c0, %c0_3] : memref<32x256xf32, #tpu.memory_space<vmem>>, vector<32x256xf32>
      %12 = arith.truncf %11 : vector<32x256xf32> to vector<32x256xbf16>
      %c0_4 = arith.constant 0 : index
      %c0_5 = arith.constant 0 : index
      %13 = vector.load %arg6[%c0_4, %c0_5] : memref<32x256xbf16, #tpu.memory_space<vmem>>, vector<32x256xbf16>
      tpu.vector_store %arg6[%c0_4, %c0_5], %12 {strides = array<i32>} : memref<32x256xbf16, #tpu.memory_space<vmem>>, vector<32x256xbf16>,
    } else {
    }
    return
  }
  func.func @transform_0(%arg0: i32, %arg1: i32, %arg2: memref<2xi32, #tpu.memory_space<smem>>, %arg3: memref<2xi32, #tpu.memory_space<smem>>) -> (i32, i32) {
    %0 = arith.index_cast %arg0 : i32 to index
    %1 = memref.load %arg3[%0] : memref<2xi32, #tpu.memory_space<smem>>
    %c1_i32 = arith.constant 1 : i32
    %2 = arith.subi %1, %c1_i32 : i32
    %c0_i32 = arith.constant 0 : i32
    %3 = arith.maxsi %2, %c0_i32 : i32
    %4 = arith.minsi %arg1, %3 : i32
    %5 = arith.index_cast %arg0 : i32 to index
    %6 = memref.load %arg2[%5] : memref<2xi32, #tpu.memory_space<smem>>
    %7 = arith.addi %6, %4 : i32
    %c1_i32_0 = arith.constant 1 : i32
    %8 = arith.minsi %7, %c1_i32_0 : i32
    %c0_i32_1 = arith.constant 0 : i32
    %c0_i32_2 = arith.constant 0 : i32
    return %c0_i32_1, %8 : i32, i32
  }
  func.func @transform_1(%arg0: i32, %arg1: i32, %arg2: memref<2xi32, #tpu.memory_space<smem>>, %arg3: memref<2xi32, #tpu.memory_space<smem>>) -> (i32, i32) {
    %0 = arith.index_cast %arg0 : i32 to index
    %1 = memref.load %arg3[%0] : memref<2xi32, #tpu.memory_space<smem>>
    %c1_i32 = arith.constant 1 : i32
    %2 = arith.subi %1, %c1_i32 : i32
    %c0_i32 = arith.constant 0 : i32
    %3 = arith.maxsi %2, %c0_i32 : i32
    %4 = arith.minsi %arg1, %3 : i32
    %5 = arith.index_cast %arg0 : i32 to index
    %6 = memref.load %arg2[%5] : memref<2xi32, #tpu.memory_space<smem>>
    %7 = arith.addi %6, %4 : i32
    %c1_i32_0 = arith.constant 1 : i32
    %8 = arith.minsi %7, %c1_i32_0 : i32
    %c0_i32_1 = arith.constant 0 : i32
    %c0_i32_2 = arith.constant 0 : i32
    return %8, %c0_i32_1 : i32, i32
  }
  func.func @transform_2(%arg0: i32, %arg1: i32, %arg2: memref<2xi32, #tpu.memory_space<smem>>, %arg3: memref<2xi32, #tpu.memory_space<smem>>) -> (i32, i32) {
    %c0_i32 = arith.constant 0 : i32
    %c0_i32_0 = arith.constant 0 : i32
    return %arg0, %c0_i32 : i32, i32
  }
}

</mosaic_0001>

<bundles_post_ra>
// kernel: tpu_custom_call.1
= control target key start
LH: loop header
LB: loop body
LE: loop exit
PB: predicated region body
PF: predicated region fallthrough
CT: control target
= control target key end

     0   :  { %s1432_s0 = inlined_call_operand.hbm [shape: s32[2], index: 0, kind: input, shape index: {}]   ;;  %s1433_s2 = inlined_call_operand.vmem [shape: s32[1,256], index: 2, kind: input, shape index: {}]   ;;  %s1434_s3 = inlined_call_operand.hbm [shape: bf16[256,256], index: 3, kind: input, shape index: {}]   ;;  %s1435_s4 = inlined_call_operand.hbm [shape: bf16[64,256], index: 4, kind: output, shape index: {}]   ;;  %s1436_s1 = inlined_call_operand.vmem [shape: s32[2], index: 1, kind: input, shape index: {}]  }
   0x1   :  { %s902_s17 = scalar_lea.hbm %s1432_s0, 16 }
   0x2   :  { %p903_p0 = scmp.ne.s32.totalorder %s1432_s0, %s902_s17  ;;  %p906_p1 = scmp.lt.u32.totalorder %s902_s17, %s1432_s0 }
   0x4   :  { %p908_p2 = pnand %p906_p1, %p903_p0 }
   0x6   :  { %911 = shalt.err (!%p908_p2)  }
   0x7   :  { %s1080_s22 = smov [#allocation4]   ;;  %s11_s27 = sshll.u32 %s1436_s1, 4  ;;  %s12_s27 = int_to_ptr.vmem [resolvable:$true] %s11_s27 }
   0x8   :  { %10 = dma.hbm_to_smem %s1432_s0, 16, %s1080_s22, [#allocation3] }
   0x9   :  { %s912_s28 = scalar_lea.vmem %s12_s27, 16  ;;  %p917_p4 = scmp.lt.s32.totalorder %s12_s27, %s12_s27 }
   0xa   :  { %p913_p3 = scmp.ne.s32.totalorder %s12_s27, %s912_s28  ;;  %p918_p5 = scmp.lt.s32.totalorder %s912_s28, %s912_s28 }
   0xc   :  { %p919_p6 = por %p918_p5, %p917_p4 }
   0xe   :  { %p920_p7 = pnand %p919_p6, %p913_p3 }
  0x10   :  { %923 = shalt.err (!%p920_p7)  }
  0x11   :  { %s1081_s29 = smov [#allocation5]  }
  0x12   :  { %14 = dma.vmem_to_smem %s12_s27, 16, %s1081_s29, [#allocation3] }
  0x13   :  { %1026 = dma.done.wait [#allocation3], 32 }
  0x14   :  { %1027 = vsyncadd [#allocation3], 4294967264 }
  0x15   :  { %16 = sfence }
  0x16   :  { %17 = vsyncpa [#allocation7], 0 }
  0x17   :  { %19 = vsyncpa [#allocation7 + $0x1], 0 }
  0x18   :  { %20 = vsyncpa [#allocation8], 0 }
  0x19   :  { %22 = vsyncpa [#allocation8 + $0x1], 0  ;;  %s1131_s0 = smov 0   ;;  %s1133_s1 = smov 0  }
  0x1a   :  { %s1135_s30 = smov 0   ;;  %s1137_s5 = smov 0  }
  0x1b   :  { %s1139_s6 = smov 0   ;;  %s1141_s7 = smov 0  }
  0x1c   :  { %s1143_s8 = smov 0   ;;  %s1145_s9 = smov 0  }
  0x1d   :  { %s1147_s10 = smov 0   ;;  %s1149_s11 = smov 0  }
  0x1e   :  { %s1151_s12 = smov 0  }
  0x1f LB: > { %1443 = sst [smem:[#allocation17_spill]] %s1058_s7  ;;  %s37_s13 = sadd.s32 1, %s1070_s10  ;;  %s1078_s12 = sphi %s1151_s12, %s28_s12   ;;  %s1074_s11 = sphi %s1149_s11, %s1470_s11   ;;  %s1070_s10 = sphi %s1147_s10, %s1469_s10   ;;  %s1066_s9 = sphi %s1145_s9, %s1460_s9   ;;  %s1062_s8 = sphi %s1143_s8, %s1468_s8   ;;  %s1058_s7 = sphi %s1141_s7, %s1459_s7   ;;  %s1054_s6 = sphi %s1139_s6, %s1467_s6   ;;  %s1050_s5 = sphi %s1137_s5, %s1466_s5   ;;  %s1046_s30 = sphi %s1135_s30, %s1465_s30   ;;  %s1042_s1 = sphi %s1133_s1, %s1464_s1   ;;  %s1038_s0 = sphi %s1131_s0, %s1463_s0  }
  0x20   : > { %1444 = sst [smem:[#allocation18_spill]] %s1074_s11  ;;  %s40_s14 = sadd.s32 1, %s1074_s11 }
  0x21   : > { %p38_p8 = scmp.ge.s32.totalorder %s37_s13, 2  ;;  %s90_s15 = sld [smem:[#allocation5 + %s1074_s11]] }
  0x22   : > { %s677_s16 = sadd.s32 4294967295, %s1078_s12   ;;  %s678_s17 = sadd.s32 4294967294, %s1078_s12  }
  0x23   : > { %s1472_s13 = smov (%p38_p8, %s37_s13), 0  ;;  %s1474_s14 = smov (!%p38_p8, %s40_s14), %s1074_s11 }
  0x24   : > { %1445 = sst [smem:[#allocation19_spill]] %s1472_s13  ;;  %p120_p9 = scmp.ne.s32.totalorder %s1058_s7, %s1054_s6 }
  0x25   : > { %s96_s18 = sld [smem:[#allocation4 + %s1074_s11]]  ;;  %p42_p10 = scmp.ge.s32.totalorder %s1474_s14, 2 }
  0x26   : > { %p121_p11 = scmp.eq.s32.totalorder %s1078_s12, 0  ;;  %p126_p12 = scmp.ne.s32.totalorder %s1054_s6, %s1050_s5 }
  0x27   : > { %s681_s19 = sadd.s32 4294967295, %s90_s15  ;;  %s1476_s14 = smov (%p42_p10, %s1474_s14), 0 }
  0x28   : > { %1446 = sst [smem:[#allocation20_spill]] %s1476_s14  ;;  %p92_p13 = scmp.gt.s32.totalorder %s681_s19, 0 }
  0x29   : > { %p127_p0 = scmp.eq.s32.totalorder %s677_s16, 0  ;;  %s100_s20 = sld [smem:[#allocation5 + %s1476_s14]] }
  0x2a   : > { %s106_s21 = sld [smem:[#allocation4 + %s1476_s14]]  ;;  %s1478_s19 = smov (!%p92_p13, %s681_s19), 0 }
  0x2b   : > { %p1201_p1 = por %p127_p0, %p126_p12  ;;  %s136_s23 = ssub.s32 %s1074_s11, %s1476_s14 }
  0x2c   : > { %p94_p2 = scmp.lt.s32.totalorder %s1070_s10, %s1478_s19  ;;  %p1208_p3 = scmp.eq.s32.totalorder %s136_s23, 0 }
  0x2d   : > { %s1447_s22 = scalar_select %p1201_p1, 1, 0 }
  0x2e   : > { %s139_s25 = sadd.s32 1, %s1046_s30  ;;  %p149_p4 = scmp.ne.s32.totalorder %s1046_s30, %s1042_s1 }
  0x2f   : > { %s95_s26 = scalar_select %p94_p2, %s1070_s10, %s1478_s19 }
  0x30   : > { %s682_s27 = sadd.s32 4294967295, %s100_s20  ;;  %p150_p5 = scmp.eq.s32.totalorder %s677_s16, 3 }
  0x31   : > { %s97_s28 = sadd.s32 %s96_s18, %s95_s26  ;;  %p102_p6 = scmp.gt.s32.totalorder %s682_s27, 0 }
  0x32   : > { %p98_p7 = scmp.lt.s32.totalorder %s97_s28, 1  ;;  %p1216_p8 = por %p150_p5, %p149_p4 }
  0x33   : > { %s1480_s27 = smov (!%p102_p6, %s682_s27), 0  ;;  %p155_p12 = scmp.ne.s32.totalorder %s1042_s1, %s1038_s0 }
  0x34   : > { %s1449_s29 = scalar_select %p1216_p8, 1, 0 }
  0x35   : > { %s1482_s28 = smov (!%p98_p7, %s97_s28), 1  ;;  %p104_p10 = scmp.lt.s32.totalorder %s1472_s13, %s1480_s27 }
  0x36   : > { %s1226_s5 = scalar_select %p1208_p3, %s1046_s30, %s139_s25  }
  0x37   : > { %s105_s15 = scalar_select %p104_p10, %s1472_s13, %s1480_s27 }
  0x38   : > { %p156_p13 = scmp.eq.s32.totalorder %s678_s17, 3  ;;  %p1240_p4 = por %p121_p11, %p120_p9 }
  0x39   : > { %s107_s16 = sadd.s32 %s106_s21, %s105_s15  ;;  %p779_p3 = scmp.lt.s32.totalorder %s1078_s12, 4 }
  0x3a   : > { %p108_p0 = scmp.lt.s32.totalorder %s107_s16, 1  ;;  %p1231_p2 = por %p156_p13, %p155_p12 }
  0x3b   : > { %s113_s20 = sadd.s32 1, %s1058_s7  ;;  %p1248_p6 = pnand %p779_p3, %p1240_p4 }
  0x3c   : > { %s1450_s18 = scalar_select %p1231_p2, 1, 0 }
  0x3d   : > { %s1484_s16 = smov (!%p108_p0, %s107_s16), 1  ;;  %p690_p9 = scmp.ge.s32.totalorder %s1078_s12, 1 }
  0x3e   : > { %s110_s17 = ssub.s32 %s1482_s28, %s1484_s16  ;;  %p232_p11 = scmp.lt.s32.totalorder %s1078_s12, 5 }
  0x3f   : > { %p111_p5 = scmp.eq.s32.totalorder %s110_s17, 0  ;;  %s202_s28 = sand.u32 1, %s1058_s7  }
  0x40   : > { %s759_s23 = scalar_select %p1240_p4, [#allocation5], [#allocation10] }
  0x41   : > { %s1255_s24 = scalar_select %p111_p5, %s1058_s7, %s113_s20  }
  0x42   : > { %s760_s25 = scalar_select %p1240_p4, %s1074_s11, 0 }
  0x43   : > { %1453 = sst [smem:[#allocation21_spill]] %s1255_s24  ;;  %s1486_s23 = smov (!%p779_p3, %s759_s23), [#allocation12] }
  0x44   : > { %s1488_s25 = smov (!%p779_p3, %s760_s25), 0  ;;  %p1265_p7 = pnand %p690_p9, %p232_p11 }
  0x45   : > { %s761_s26 = scalar_select %p1240_p4, [#allocation4], [#allocation11] }
  0x46   : > { %s207_s27 = sld [smem:[%s1486_s23 + %s1488_s25]]  ;;  %s685_s20 = sshll.u32 %s202_s28, 7 }
  0x47   : > { %s1490_s26 = smov (!%p779_p3, %s761_s26), [#allocation13]  ;;  %s206_s19 = scalar_lea.vmem [#allocation6], %s685_s20 }
  0x48   : > { %s213_s17 = sld [smem:[%s1490_s26 + %s1488_s25]]  ;;  %s224_s13 = sshll.u32 %s206_s19, 4  ;;  %s1271_s13 = int_to_ptr.vmem [resolvable:$true] %s224_s13 }
  0x49   : > { %s1278_s25 = scalar_lea.sflag [#allocation7], %s202_s28  ;;  %p926_p4 = pneg %p1248_p6 }
  0x4a   : > { %s929_s11 = scalar_lea.hbm %s1434_s3, 4096 }
  0x4c   : > { %s686_s15 = sadd.s32 4294967295, %s207_s27 }
  0x4d   : > { %p209_p10 = scmp.gt.s32.totalorder %s686_s15, 0 }
  0x4f   : > { %s1492_s15 = smov (!%p209_p10, %s686_s15), 0 }
  0x50   : > { %p211_p12 = scmp.lt.s32.totalorder %s1070_s10, %s1492_s15 }
  0x52   : > { %s212_s14 = scalar_select %p211_p12, %s1070_s10, %s1492_s15 }
  0x54   : > { %s214_s23 = sadd.s32 %s213_s17, %s212_s14 }
  0x55   : > { %p215_p13 = scmp.lt.s32.totalorder %s214_s23, 1 }
  0x57   : > { %s1494_s23 = smov (!%p215_p13, %s214_s23), 1 }
  0x58   : > { %s736_s27 = sshll.u32 %s1494_s23, 11 }
  0x59   : > { %s1276_s7 = scalar_lea.hbm %s1434_s3, %s736_s27 }
  0x5a   : > { %s924_s26 = scalar_lea.hbm %s1276_s7, 2048  ;;  %p930_p9 = scmp.lt.u32.totalorder %s1276_s7, %s1434_s3 }
  0x5b   : > { %p925_p0 = scmp.ne.s32.totalorder %s1276_s7, %s924_s26  ;;  %p931_p11 = scmp.lt.u32.totalorder %s929_s11, %s924_s26 }
  0x5c   : > { %p933_p12 = scmp.lt.u32.totalorder %s924_s26, %s1276_s7 }
  0x5d   : > { %p927_p3 = pnand %p926_p4, %p925_p0  ;;  %p932_p10 = por %p931_p11, %p930_p9 }
  0x5f   : > { %p928_p5 = pneg %p927_p3  ;;  %p934_p13 = por %p933_p12, %p932_p10 }
  0x61   : > { %p935_p2 = pnand %p934_p13, %p928_p5 }
  0x63   : > { %938 = shalt.err (!%p935_p2)
}
  0x64   : > { %s939_s28 = scalar_lea.vmem %s1271_s13, 2048  ;;  %s1082_s20 = smov [#allocation6]  }
  0x65   : > { %p940_p0 = scmp.ne.s32.totalorder %s1271_s13, %s939_s28  ;;  %s944_s19 = sshll.u32 %s1082_s20, 4  ;;  %s945_s19 = int_to_ptr.vmem [resolvable:$false] %s944_s19 }
  0x66   : > { %s946_s23 = scalar_lea.vmem %s945_s19, 4096  ;;  %p947_p1 = scmp.lt.s32.totalorder %s1271_s13, %s945_s19 }
  0x67   : > { %p942_p3 = pnand %p940_p0, %p926_p4  ;;  %p948_p9 = scmp.lt.s32.totalorder %s946_s23, %s939_s28 }
  0x69   : > { %p943_p8 = pneg %p942_p3  ;;  %p949_p11 = por %p948_p9, %p947_p1 }
  0x6b   : > { %p950_p10 = pnand %p949_p11, %p943_p8 }
  0x6d   : > { %953 = shalt.err (!%p950_p10)
}
  0x6e   : > { %s1083_s27 = smov 128   ;;  %s1084_s26 = smov 8  }
  0x6f   : > { %774 = dma.hbm_to_vmem [thread:$0]  (!%p1248_p6), %s1276_s7, 2048, %s1271_s13, %s1278_s25, %s1083_s27, %s1083_s27, %s1084_s26  }
  0x70   : > { %236 = sbr.rel (%p1265_p7) target bundleno = 436 (0x1b4), region = 28  ;;  %s238_s14 = sand.u32 (!%p1265_p7), 1, %s1054_s6  }
  0x71   : > { %s691_s15 = sshll.u32 (!%p1265_p7), %s238_s14, 7  ;;  %s239_s11 = scalar_lea.sflag (!%p1265_p7), [#allocation7], %s238_s14 }
  0x72   : > { %s1309_s24 = scalar_lea.vmem (!%p1265_p7), [#allocation6], %s691_s15  ;;  %p1455_p1 = scmp.ne.s32.totalorder (!%p1265_p7), %s1447_s22, 0 }
  0x77   : > { %1029 = dma.done.wait (%p1455_p1), %s239_s11, 2048  }
  0x78   : > { %1031 = vsyncadd (%p1455_p1), %s239_s11, 4294965248  ;;  %s273_s7 = sand.u32 1, %s1042_s1   ;;  %s276_s13 = sld [smem:[#allocation5 + %s1066_s9]] }
  0x79   : > { %s692_s21 = sshll.u32 %s273_s7, 5  ;;  %s282_s25 = sld [smem:[#allocation4 + %s1066_s9]] }
  0x7a   : > { %s1328_s23 = scalar_lea.vmem [#allocation9], %s692_s21  ;;  %p697_p7 = scmp.ne.s32.totalorder %s1062_s8, 0 }
  0x7b   : > { %v1085_v0 = vmov (!%p697_p7), 0.0  }
  0x7c   : > { %316 = vst [vmem:[#allocation2] sm:$0xff] (!%p697_p7), %v1085_v0  ;;  %317 = vst [vmem:[#allocation2 + $0x8] sm:$0xff] (!%p697_p7), %v1085_v0 }
  0x7d   : > { %318 = vst [vmem:[#allocation2 + $0x10] sm:$0xff] (!%p697_p7), %v1085_v0  ;;  %319 = vst [vmem:[#allocation2 + $0x18] sm:$0xff] (!%p697_p7), %v1085_v0 }
  0x7e   : > { %s693_s16 = sadd.s32 4294967295, %s276_s13  ;;  %320 = vst [vmem:[#allocation2 + $0x20] sm:$0xff] (!%p697_p7), %v1085_v0  ;;  %321 = vst [vmem:[#allocation2 + $0x28] sm:$0xff] (!%p697_p7), %v1085_v0 }
  0x7f   : > { %p278_p8 = scmp.gt.s32.totalorder %s693_s16, 0  ;;  %322 = vst [vmem:[#allocation2 + $0x30] sm:$0xff] (!%p697_p7), %v1085_v0  ;;  %323 = vst [vmem:[#allocation2 + $0x38] sm:$0xff] (!%p697_p7), %v1085_v0 }
  0x81   : > { %s1496_s16 = smov (!%p278_p8, %s693_s16), 0 }
  0x82   : > { %p280_p2 = scmp.lt.s32.totalorder %s1062_s8, %s1496_s16 }
  0x84   : > { %s281_s17 = scalar_select %p280_p2, %s1062_s8, %s1496_s16 }
  0x85   : > { %315 = sbr.rel (%p697_p7) target bundleno = 140 (0x8c), region = 36 }
  0x86   : > { %s283_s28 = sadd.s32 %s282_s25, %s281_s17 }
  0x87   : > { %p284_p6 = scmp.lt.s32.totalorder %s283_s28, 1 }
  0x89   : > { %s1498_s28 = smov (!%p284_p6, %s283_s28), 1 }
  0x8a   : > { %s1500_s28 = smov (!%p284_p6, %s1498_s28), 1 }
  0x8b   : > { %s288_s19 = scalar_lea.vmem %s1433_s2, %s1500_s28 }
  0x8c PF: > { %s324_s27 = sld [smem:[#allocation5 + %s1066_s9]] }
  0x92   : > { %p698_p4 = scmp.ge.s32.totalorder %s1062_s8, %s324_s27 }
  0x93   : > { %v878_v1 = vld [vmem:[%s1309_s24 + $0x4] ss:$8 sps:$4 sm:$0xff] (!%p698_p4)   ;;  %v880_v2 = vld [vmem:[%s1309_s24] ss:$8 sps:$4 sm:$0xff] (!%p698_p4)   ;;  %v1086_v3 = vmov (!%p698_p4), 0   ;;  %v333_v10 = vlaneseq (!%p698_p4)  ;;  %s699_s26 = sshll.u32 (!%p698_p4), %s1066_s9, 5 }
  0x94   : > { %328 = sbr.rel (%p698_p4) target bundleno = 399 (0x18f), region = 40  ;;  %492 = vmatprep.mubr.bf16.mxu0 (!%p698_p4), %v1086_v3  ;;  %502 = vmatprep.mubr.bf16.mxu1 (!%p698_p4), %v1086_v3  ;;  %v881_v4 = vld [vmem:[%s1309_s24 + $0x14] ss:$8 sps:$4 sm:$0xff] (!%p698_p4)   ;;  %v883_v5 = vld [vmem:[%s1309_s24 + $0x10] ss:$8 sps:$4 sm:$0xff] (!%p698_p4)   ;;  %v331_v16 = vstv (!%p698_p4), %s699_s26  ;;  %v356_v29 = vld [vmem:[#allocation2] sm:$0xff] (!%p698_p4) }
  0x95   : > { %460 = vmatprep.subr.bf16.mxu0 (!%p698_p4), %v878_v1  ;;  %743 = vmatprep.subr.bf16.mxu1 (!%p698_p4), %v878_v1  ;;  %v884_v6 = vld [vmem:[%s1309_s24 + $0x24] ss:$8 sps:$4 sm:$0xff] (!%p698_p4)   ;;  %v886_v7 = vld [vmem:[%s1309_s24 + $0x20] ss:$8 sps:$4 sm:$0xff] (!%p698_p4)   ;;  %v887_v8 = vld [vmem:[%s1309_s24 + $0x34] ss:$8 sps:$4 sm:$0xff] (!%p698_p4)  }
  0x96   : > { %461 = vmatpush1.bf16.msra.mxu0 (!%p698_p4), %v880_v2  ;;  %751 = vmatpush1.bf16.msra.mxu1 (!%p698_p4), %v880_v2  ;;  %v889_v9 = vld [vmem:[%s1309_s24 + $0x30] ss:$8 sps:$4 sm:$0xff] (!%p698_p4)   ;;  %v890_v11 = vld [vmem:[%s1309_s24 + $0x44] ss:$8 sps:$4 sm:$0xff] (!%p698_p4)   ;;  %v892_v12 = vld [vmem:[%s1309_s24 + $0x40] ss:$8 sps:$4 sm:$0xff] (!%p698_p4)  }
  0x97   : > { %462 = vmatprep.subr.bf16.mxu0 (!%p698_p4), %v881_v4  ;;  %744 = vmatprep.subr.bf16.mxu1 (!%p698_p4), %v881_v4  ;;  %v334_v13 = vshrl.u32 (!%p698_p4), %v333_v10, 7  ;;  %v893_v14 = vld [vmem:[%s1309_s24 + $0x54] ss:$8 sps:$4 sm:$0xff] (!%p698_p4)   ;;  %v329_v15 = vld [vmem:[%s288_s19] sm:$0x1] (!%p698_p4)  ;;  %v360_v30 = vld [vmem:[#allocation2 + $0x20] sm:$0xff] (!%p698_p4) }
  0x98   : > { %v895_v17 = vld [vmem:[%s1309_s24 + $0x50] ss:$8 sps:$4 sm:$0xff] (!%p698_p4)   ;;  %v332_v18 = vsub.s32 (!%p698_p4), %v329_v15, %v331_v16  ;;  %v896_v20 = vld [vmem:[%s1309_s24 + $0x64] ss:$8 sps:$4 sm:$0xff] (!%p698_p4)   ;;  %v898_v21 = vld [vmem:[%s1309_s24 + $0x60] ss:$8 sps:$4 sm:$0xff] (!%p698_p4)  }
  0x99   : > { %v340_v19 = vsub.s32 (!%p698_p4), 0, %v334_v13  ;;  %v335_v22 = vadd.s32 (!%p698_p4), 8, %v334_v13  ;;  %v899_v24 = vld [vmem:[%s1309_s24 + $0x74] ss:$8 sps:$4 sm:$0xff] (!%p698_p4)   ;;  %v336_v25 = vadd.s32 (!%p698_p4), 16, %v334_v13  ;;  %v337_v26 = vadd.s32 (!%p698_p4), 24, %v334_v13 }
  0x9a   : > { %463 = vmatpush1.bf16.msra.mxu0 (!%p698_p4), %v883_v5  ;;  %752 = vmatpush1.bf16.msra.mxu1 (!%p698_p4), %v883_v5  ;;  %v901_v27 = vld [vmem:[%s1309_s24 + $0x70] ss:$8 sps:$4 sm:$0xff] (!%p698_p4)   ;;  %v1087_v28 = vmov (!%p698_p4), 1.0|1.0   ;;  %v357_v31 = vld [vmem:[#allocation2 + $0x8] sm:$0xff] (!%p698_p4) }
  0x9b   : > { %464 = vmatprep.subr.bf16.mxu0 %v884_v6  ;;  %745 = vmatprep.subr.bf16.mxu1 %v884_v6  ;;  %v341_v23 = vrot.slane %v332_v18, %v340_v19  ;;  %v361_v32 = vld [vmem:[#allocation2 + $0x28] sm:$0xff]  ;;  %v358_v35 = vld [vmem:[#allocation2 + $0x10] sm:$0xff]  ;;  %v359_v41 = vld [vmem:[#allocation2 + $0x18] sm:$0xff] }
  0x9c   : > { %v362_v36 = vld [vmem:[#allocation2 + $0x30] sm:$0xff]  ;;  %v363_v42 = vld [vmem:[#allocation2 + $0x38] sm:$0xff] }
  0x9d   : > { %vm342_vm0 = vcmp.eq.s32.totalorder %v334_v13, %v341_v23  ;;  %vm343_vm1 = vcmp.eq.s32.totalorder %v335_v22, %v341_v23  ;;  %vm344_vm2 = vcmp.eq.s32.totalorder %v336_v25, %v341_v23  ;;  %vm345_vm3 = vcmp.eq.s32.totalorder %v337_v26, %v341_v23 }
  0x9e   : > { %465 = vmatpush1.bf16.msra.mxu0 %v886_v7  ;;  %753 = vmatpush1.bf16.msra.mxu1 %v886_v7  ;;  %vm720_vm4 = vmpackc.low %vm343_vm1, %vm342_vm0 }
  0x9f   : > { %466 = vmatprep.subr.bf16.mxu0 %v887_v8  ;;  %746 = vmatprep.subr.bf16.mxu1 %v887_v8  ;;  %vm722_vm5 = vmpackc.low %vm345_vm3, %vm344_vm2 }
  0xa2   : > { %467 = vmatpush1.bf16.msra.mxu0 %v889_v9  ;;  %754 = vmatpush1.bf16.msra.mxu1 %v889_v9 }
  0xa3   : > { %468 = vmatprep.subr.bf16.mxu0 %v890_v11  ;;  %747 = vmatprep.subr.bf16.mxu1 %v890_v11 }
  0xa6   : > { %469 = vmatpush1.bf16.msra.mxu0 %v892_v12  ;;  %755 = vmatpush1.bf16.msra.mxu1 %v892_v12 }
  0xa7   : > { %470 = vmatprep.subr.bf16.mxu0 %v893_v14  ;;  %748 = vmatprep.subr.bf16.mxu1 %v893_v14 }
  0xaa   : > { %471 = vmatpush1.bf16.msra.mxu0 %v895_v17  ;;  %756 = vmatpush1.bf16.msra.mxu1 %v895_v17 }
  0xab   : > { %472 = vmatprep.subr.bf16.mxu0 %v896_v20  ;;  %749 = vmatprep.subr.bf16.mxu1 %v896_v20 }
  0xae   : > { %473 = vmatpush1.bf16.msra.mxu0 %v898_v21  ;;  %757 = vmatpush1.bf16.msra.mxu1 %v898_v21 }
  0xaf   : > { %474 = vmatprep.subr.bf16.mxu0 %v899_v24  ;;  %750 = vmatprep.subr.bf16.mxu1 %v899_v24 }
  0xb2   : > { %475 = vmatpush1.bf16.msra.mxu0 %v901_v27  ;;  %758 = vmatpush1.bf16.msra.mxu1 %v901_v27 }
  0xb5   : > { %721 = vmatmul.mubr.msk.bf16.vlgmr.msra.gmra.mrb[0].mxu0 %vm720_vm4, %v1087_v28  ;;  %723 = vmatmul.mubr.msk.bf16.vlgmr.msra.gmra.mrb[0].mxu1 %vm722_vm5, %v1087_v28 }
 0x188   : > { %v494_v33 = vpop.f32.mrb[0].mxu0  ;;  %v504_v34 = vpop.f32.mrb[0].mxu1 }
 0x189   : > { %v513_v37 = vadd.f32 %v494_v33, %v356_v29  ;;  %v517_v38 = vadd.f32 %v504_v34, %v360_v30  ;;  %v496_v39 = vpop.f32.mrb[1].mxu0  ;;  %v506_v40 = vpop.f32.mrb[1].mxu1 }
 0x18a   : > { %v514_v43 = vadd.f32 %v496_v39, %v357_v31  ;;  %v518_v44 = vadd.f32 %v506_v40, %v361_v32  ;;  %v498_v45 = vpop.f32.mrb[2].mxu0  ;;  %v508_v46 = vpop.f32.mrb[2].mxu1 }
 0x18b   : > { %521 = vst [vmem:[#allocation2] sm:$0xff] %v513_v37  ;;  %525 = vst [vmem:[#allocation2 + $0x20] sm:$0xff] %v517_v38  ;;  %v515_v47 = vadd.f32 %v498_v45, %v358_v35  ;;  %v519_v48 = vadd.f32 %v508_v46, %v362_v36  ;;  %v500_v49 = vpop.f32.mrb[3].mxu0  ;;  %v510_v50 = vpop.f32.mrb[3].mxu1 }
 0x18c   : > { %522 = vst [vmem:[#allocation2 + $0x8] sm:$0xff] %v514_v43  ;;  %526 = vst [vmem:[#allocation2 + $0x28] sm:$0xff] %v518_v44  ;;  %v516_v51 = vadd.f32 %v500_v49, %v359_v41  ;;  %v520_v52 = vadd.f32 %v510_v50, %v363_v42 }
 0x18d   : > { %523 = vst [vmem:[#allocation2 + $0x10] sm:$0xff] %v515_v47  ;;  %527 = vst [vmem:[#allocation2 + $0x30] sm:$0xff] %v519_v48 }
 0x18e   : > { %524 = vst [vmem:[#allocation2 + $0x18] sm:$0xff] %v516_v51  ;;  %528 = vst [vmem:[#allocation2 + $0x38] sm:$0xff] %v520_v52 }
 0x18f PF: > { %p724_p5 = scmp.ne.s32.totalorder %s1062_s8, 1 }
 0x191   : > { %532 = sbr.rel (%p724_p5) target bundleno = 410 (0x19a), region = 44 }
 0x192   : > { %v533_v53 = vld [vmem:[#allocation2] sm:$0xff] (!%p724_p5) }
 0x193   : > { %v534_v54 = vld [vmem:[#allocation2 + $0x8] sm:$0xff] (!%p724_p5)  ;;  %v537_v58 = vld [vmem:[#allocation2 + $0x20] sm:$0xff] (!%p724_p5) }
 0x194   : > { %v535_v55 = vld [vmem:[#allocation2 + $0x10] sm:$0xff] (!%p724_p5)  ;;  %v737_v56 = vpack.c.bf16 (!%p724_p5), %v534_v54, %v533_v53  ;;  %v538_v59 = vld [vmem:[#allocation2 + $0x28] sm:$0xff] (!%p724_p5) }
 0x195   : > { %v536_v57 = vld [vmem:[#allocation2 + $0x18] sm:$0xff] (!%p724_p5)  ;;  %v739_v61 = vpack.c.bf16 (!%p724_p5), %v538_v59, %v537_v58  ;;  %v539_v62 = vld [vmem:[#allocation2 + $0x30] sm:$0xff] (!%p724_p5) }
 0x196   : > { %v738_v60 = vpack.c.bf16 (!%p724_p5), %v536_v57, %v535_v55  ;;  %v540_v63 = vld [vmem:[#allocation2 + $0x38] sm:$0xff] (!%p724_p5)  ;;  %565 = vst [vmem:[%s1328_s23] sm:$0xff] (!%p724_p5), %v737_v56 }
 0x197   : > { %v740_v0 = vpack.c.bf16 (!%p724_p5), %v540_v63, %v539_v62  ;;  %567 = vst [vmem:[%s1328_s23 + $0x10] sm:$0xff] (!%p724_p5), %v739_v61 }
 0x198   : > { %566 = vst [vmem:[%s1328_s23 + $0x8] sm:$0xff] %v738_v60 }
 0x199   : > { %568 = vst [vmem:[%s1328_s23 + $0x18] sm:$0xff] %v740_v0 }
 0x19a PF: > { %s742_s8 = sshll.u32 %s1066_s9, 9  ;;  %s584_s21 = sshll.u32 %s1328_s23, 4  ;;  %s1367_s21 = int_to_ptr.vmem [resolvable:$true] %s584_s21 }
 0x19b   : > { %s1364_s13 = scalar_lea.hbm %s1435_s4, %s742_s8  ;;  %s1371_s16 = scalar_lea.sflag [#allocation8], %s273_s7 }
 0x19c   : > { %s954_s25 = scalar_lea.vmem %s1367_s21, 512  ;;  %p1456_p13 = scmp.ne.s32.totalorder %s1449_s29, 0 }
 0x19d   : > { %p955_p12 = scmp.ne.s32.totalorder %s1367_s21, %s954_s25  ;;  %s1088_s9 = smov [#allocation9]  }
 0x19e   : > { %s958_s17 = sshll.u32 %s1088_s9, 4  ;;  %s959_s17 = int_to_ptr.vmem [resolvable:$false] %s958_s17 }
 0x19f   : > { %p956_p0 = pnand %p955_p12, %p1456_p13  ;;  %s960_s28 = scalar_lea.vmem %s959_s17, 1024 }
 0x1a0   : > { %p961_p9 = scmp.lt.s32.totalorder %s1367_s21, %s959_s17  ;;  %p962_p11 = scmp.lt.s32.totalorder %s960_s28, %s954_s25 }
 0x1a1   : > { %p957_p3 = pneg %p956_p0 }
 0x1a2   : > { %p963_p10 = por %p962_p11, %p961_p9 }
 0x1a4   : > { %p964_p1 = pnand %p963_p10, %p957_p3 }
 0x1a6   : > { %967 = shalt.err (!%p964_p1)
}
 0x1a7   : > { %s968_s7 = scalar_lea.hbm %s1364_s13, 512  ;;  %s972_s19 = scalar_lea.hbm %s1435_s4, 1024 }
 0x1a8   : > { %p969_p8 = scmp.ne.s32.totalorder %s1364_s13, %s968_s7  ;;  %p973_p7 = scmp.lt.u32.totalorder %s1364_s13, %s1435_s4 }
 0x1a9   : > { %p974_p4 = scmp.lt.u32.totalorder %s972_s19, %s968_s7  ;;  %p976_p12 = scmp.lt.u32.totalorder %s968_s7, %s1364_s13 }
 0x1aa   : > { %p970_p2 = pnand %p969_p8, %p1456_p13 }
 0x1ab   : > { %p975_p5 = por %p974_p4, %p973_p7 }
 0x1ac   : > { %p971_p6 = pneg %p970_p2 }
 0x1ad   : > { %p977_p0 = por %p976_p12, %p975_p5 }
 0x1af   : > { %p978_p3 = pnand %p977_p0, %p971_p6 }
 0x1b1   : > { %981 = shalt.err (!%p978_p3)
}
 0x1b2   : > { %s1089_s26 = smov 128   ;;  %s1090_s14 = smov 8  }
 0x1b3   : > { %765 = dma.vmem_to_hbm [thread:$0]  (%p1456_p13), %s1367_s21, 512, %s1364_s13, %s1371_s16, %s1089_s26, %s1089_s26, %s1090_s14  }
 0x1b4 PF: > { %p780_p9 = scmp.ge.s32.totalorder %s1078_s12, 2  ;;  %s599_s15 = sand.u32 1, %s1038_s0  }
 0x1b5   : > { %p1457_p11 = scmp.ne.s32.totalorder %s1450_s18, 0  ;;  %s600_s8 = scalar_lea.sflag [#allocation8], %s599_s15 }
 0x1b7   : > { %p776_p10 = pnand %p780_p9, %p1457_p11 }
 0x1b9   : > { %1033 = dma.done.wait (!%p776_p10), %s600_s8, 512  }
 0x1ba   : > { %1035 = vsyncadd (!%p776_p10), %s600_s8, 4294966784  ;;  %s28_s12 = sadd.s32 1, %s1078_s12   ;;  %s1458_s29 = sld [smem:[#allocation17_spill]] }
 0x1bb   : > { %p25_p1 = scmp.ge.s32.totalorder %s28_s12, 6   ;;  %s1459_s7 = sld [smem:[#allocation21_spill]] }
 0x1bc   : > { %s1460_s9 = sld [smem:[#allocation18_spill]]  ;;  %s1461_s11 = sld [smem:[#allocation19_spill]] }
 0x1bd   : > { %s1462_s24 = sld [smem:[#allocation20_spill]]  ;;  %s1463_s0 = smov %s1042_s1 }
 0x1be   : > { %s1464_s1 = smov %s1046_s30  ;;  %s1465_s30 = smov %s1226_s5 }
 0x1bf   : > { %s1466_s5 = smov %s1054_s6  ;;  %s1468_s8 = smov %s1070_s10 }
 0x1c0   : > { %s1467_s6 = smov %s1458_s29  ;;  %27 = sbr.rel (!%p25_p1) target bundleno = 31 (0x1f), region = 88 }
 0x1c2   : > { %s1469_s10 = smov %s1461_s11 }
 0x1c3   : > { %s1470_s11 = smov %s1462_s24 }
 0x1c7   :  { %605 = vsyncpa [#allocation7], 1 }
 0x1c8   :  { %607 = vsyncpa [#allocation7 + $0x1], 1 }
 0x1c9   :  { %608 = vsyncpa [#allocation8], 1 }
 0x1ca   :  { %610 = vsyncpa [#allocation8 + $0x1], 1 }

</bundles_post_ra>
